<compile_context>
chip_gen: v7x
topology: tpu7x:2x2x1
jax: 0.10.0
libtpu: 0.0.40
codegen_flags: <defaults>
</compile_context>

<pallas_src>
import functools

import jax
import jax.numpy as jnp
from jax.experimental import pallas as pl
from jax.experimental.pallas import tpu as pltpu

EPS = 1e-5


def _round_up(x, m):
    return (x + m - 1) // m * m


# --------------------------------------------------------------------------- #
# Kernel
# --------------------------------------------------------------------------- #
def tabular_mlp_kernel(x_ref, w_ref, b_ref, out_ref, *, in_pad, h_pad):
    # Dropout layers are identity in eval mode; BatchNorms are pre-folded into
    # the weight/bias slabs, so the kernel is Linear->ReLU->Linear->ReLU->Linear.
    x = x_ref[...].astype(jnp.bfloat16)

    # Static carve of the packed weight slab (section starts are multiples of 16,
    # matching bf16 sublane packing).
    w1 = w_ref[0:in_pad, :]                       # (IN_PAD, H_PAD)
    w2 = w_ref[in_pad:in_pad + h_pad, :]          # (H_PAD, H_PAD)
    wo = w_ref[in_pad + h_pad:in_pad + 2 * h_pad, :]  # (H_PAD, H_PAD)

    h = jnp.dot(x, w1, preferred_element_type=jnp.float32) + b_ref[0:1, :]
    h = jnp.maximum(h, 0.0)

    h = (jnp.dot(h.astype(jnp.bfloat16), w2, preferred_element_type=jnp.float32)
         + b_ref[1:2, :])
    h = jnp.maximum(h, 0.0)

    out_ref[...] = (jnp.dot(h.astype(jnp.bfloat16), wo,
                            preferred_element_type=jnp.float32)
                    + b_ref[2:3, :])


# --------------------------------------------------------------------------- #
# One-time parameter preparation (BN folding + slab packing)
# --------------------------------------------------------------------------- #
def prepare_params(params):
    """Fold eval-mode BatchNorms into the Linears, transpose to (in, out),
    zero-pad, and pack into one bf16 weight slab + one f32 bias slab."""
    emb_tables = [t.astype(jnp.float32) for t in params["emb_tables"]]
    n_emb = sum(int(t.shape[1]) for t in emb_tables)
    n_cont = int(params["cont_bn"].shape[1])
    L1 = int(params["w1"].shape[0])
    L2 = int(params["w2"].shape[0])
    out_sz = int(params["wo"].shape[0])
    n_in = n_emb + n_cont

    def fold_pre_bn(w_t, b, bn):
        # BN (eval, running stats) applied to the *input* features of a Linear
        # with weight w_t:(in,out), bias b:(out,).  bn rows: gamma,beta,mean,var.
        gamma, beta, mean, var = bn[0], bn[1], bn[2], bn[3]
        s = gamma * jax.lax.rsqrt(var + EPS)
        return w_t * s[:, None], b + (beta - mean * s) @ w_t

    # Layer 1: fold cont_bn into the continuous-feature rows of W1.
    w1_t = params["w1"].T                                     # (n_in, L1)
    w1e, w1c = w1_t[:n_emb], w1_t[n_emb:]
    w1c, b1 = fold_pre_bn(w1c, params["b1"], params["cont_bn"])
    w1_t = jnp.concatenate([w1e, w1c], axis=0)

    # Layer 2 folds bn1; output layer folds bn2.
    w2_t, b2 = fold_pre_bn(params["w2"].T, params["b2"], params["bn1"])
    wo_t, bo = fold_pre_bn(params["wo"].T, params["bo"], params["bn2"])

    in_pad = _round_up(n_in, 16)                    # bf16 sublane-pack friendly
    h_pad = _round_up(max(L1, L2, out_sz), 16)      # common lane width

    def pad2(a, rows, cols):
        return jnp.zeros((rows, cols), jnp.float32).at[:a.shape[0], :a.shape[1]].set(a)

    w_slab = jnp.concatenate(
        [pad2(w1_t, in_pad, h_pad),
         pad2(w2_t, h_pad, h_pad),
         pad2(wo_t, h_pad, h_pad)], axis=0).astype(jnp.bfloat16)

    b_slab = (jnp.zeros((3, h_pad), jnp.float32)
              .at[0, :L1].set(b1)
              .at[1, :L2].set(b2)
              .at[2, :out_sz].set(bo))

    return {"emb_tables": emb_tables, "w_slab": w_slab, "b_slab": b_slab,
            "n_in": n_in, "in_pad": in_pad, "h_pad": h_pad, "out_sz": out_sz}


# --------------------------------------------------------------------------- #
# Forward wrapper
# --------------------------------------------------------------------------- #
def tabular_forward(x_cat, x_cont, prep):
    # Embedding gather + concat is glue (plain JAX); at small batch keeping it
    # outside the kernel is the right trade-off.
    emb_parts = [tbl[x_cat[:, i]] for i, tbl in enumerate(prep["emb_tables"])]
    x_in = jnp.concatenate(emb_parts + [x_cont.astype(jnp.float32)], axis=1)

    B = x_in.shape[0]
    in_pad, h_pad, out_sz = prep["in_pad"], prep["h_pad"], prep["out_sz"]

    tb = min(512, _round_up(B, 8))      # batch tile; modest so it fits v7x VMEM too
    b_pad = _round_up(B, tb)
    x_in = jnp.pad(x_in, ((0, b_pad - B), (0, in_pad - x_in.shape[1])))

    kernel = functools.partial(tabular_mlp_kernel, in_pad=in_pad, h_pad=h_pad)
    out = pl.pallas_call(
        kernel,
        out_shape=jax.ShapeDtypeStruct((b_pad, h_pad), jnp.float32),
        grid_spec=pltpu.PrefetchScalarGridSpec(
            num_scalar_prefetch=0,
            grid=(b_pad // tb,),
            in_specs=[
                pl.BlockSpec((tb, in_pad), lambda i: (i, 0)),
                # Constant block index -> weight/bias slabs stay VMEM-resident
                # across batch tiles (no re-DMA per grid step).
                pl.BlockSpec(prep["w_slab"].shape, lambda i: (0, 0)),
                pl.BlockSpec(prep["b_slab"].shape, lambda i: (0, 0)),
            ],
            out_specs=pl.BlockSpec((tb, h_pad), lambda i: (i, 0)),
        ),
        compiler_params=pltpu.CompilerParams(
            dimension_semantics=("parallel",)),
    )(x_in, prep["w_slab"], prep["b_slab"])

    return out[:B, :out_sz]


# --------------------------------------------------------------------------- #
# Deterministic parameters + pure-JAX reference (unfolded, for sanity check)
# --------------------------------------------------------------------------- #
def make_params(key, emb_szs, n_cont, layers, out_sz):
    keys = jax.random.split(key, 16)
    ki = iter(range(16))

    emb_tables = [jax.random.normal(keys[next(ki)], (ni, nf), jnp.float32) * 0.1
                  for ni, nf in emb_szs]
    n_emb = sum(nf for _, nf in emb_szs)
    n_in = n_emb + n_cont
    L1, L2 = layers

    def bn_params(n):
        # rows: gamma, beta, running_mean, running_var (PyTorch fresh init).
        return jnp.stack([jnp.ones((n,), jnp.float32),
                          jnp.zeros((n,), jnp.float32),
                          jnp.zeros((n,), jnp.float32),
                          jnp.ones((n,), jnp.float32)], axis=0)

    def linear(kw, kb, fan_in, fan_out):
        bound = 1.0 / jnp.sqrt(jnp.float32(fan_in))
        w = jax.random.uniform(kw, (fan_out, fan_in), jnp.float32, -bound, bound)
        b = jax.random.uniform(kb, (fan_out,), jnp.float32, -bound, bound)
        return w, b

    w1, b1 = linear(keys[next(ki)], keys[next(ki)], n_in, L1)
    w2, b2 = linear(keys[next(ki)], keys[next(ki)], L1, L2)
    wo, bo = linear(keys[next(ki)], keys[next(ki)], L2, out_sz)

    return {"emb_tables": emb_tables, "cont_bn": bn_params(n_cont),
            "w1": w1, "b1": b1, "bn1": bn_params(L1),
            "w2": w2, "b2": b2, "bn2": bn_params(L2),
            "wo": wo, "bo": bo}


def reference_forward(x_cat, x_cont, params):
    def bn(x, p):
        return (x - p[2]) * jax.lax.rsqrt(p[3] + EPS) * p[0] + p[1]
    emb = jnp.concatenate([params["emb_tables"][i][x_cat[:, i]]
                           for i in range(len(params["emb_tables"]))], axis=1)
    x = jnp.concatenate([emb, bn(x_cont, params["cont_bn"])], axis=1)
    h = jnp.maximum(x @ params["w1"].T + params["b1"], 0.0)
    h = bn(h, params["bn1"])
    h = jnp.maximum(h @ params["w2"].T + params["b2"], 0.0)
    h = bn(h, params["bn2"])
    return h @ params["wo"].T + params["bo"]


if __name__ == "__main__":
    emb_szs = [(10, 4), (8, 3)]
    n_cont = 5
    layers = [32, 16]
    out_sz = 2
    batch = 8

    key = jax.random.PRNGKey(0)
    kp, kc1, kc2, kx = jax.random.split(key, 4)
    params = make_params(kp, emb_szs, n_cont, layers, out_sz)
    prep = prepare_params(params)          # one-time: BN folding + slab packing

    x_cat = jnp.stack(
        [jax.random.randint(kc1, (batch,), 0, emb_szs[0][0]),
         jax.random.randint(kc2, (batch,), 0, emb_szs[1][0])], axis=1
    ).astype(jnp.int32)                                   # (B, 2)
    x_cont = jax.random.normal(kx, (batch, n_cont), jnp.float32)  # (B, 5)

    out = tabular_forward(x_cat, x_cont, prep)
    jax.block_until_ready(out)
    assert out.shape == (batch, out_sz)

    # Loose tolerance sanity check vs the unfolded f32 reference (bf16 MXU path).
    ref = reference_forward(x_cat, x_cont, params)
    err = float(jnp.max(jnp.abs(out - ref)))
    assert err < 1e-1, f"max abs error {err}"

    print("KERNEL_OK")
</pallas_src>

<mosaic_0001>
module attributes {stable_mosaic.version = 11 : i64} {
  func.func @tabular_mlp_kernel(%arg0: i32, %arg1: memref<8x16xf32, #tpu.memory_space<vmem>>, %arg2: memref<80x32xbf16, #tpu.memory_space<vmem>>, %arg3: memref<3x32xf32, #tpu.memory_space<vmem>>, %arg4: memref<8x32xf32, #tpu.memory_space<vmem>>) attributes {dimension_semantics = [#tpu.dimension_semantics<parallel>], iteration_bounds = array<i64: 1>, scalar_prefetch = 0 : i64, scratch_operands = 0 : i64, tpu.core_type = #tpu.core_type<tc>, window_params = [{transform_indices = @transform_0, window_bounds = array<i64: 8, 16>}, {pipeline_mode = #tpu.pipeline_mode<synchronous>, transform_indices = @transform_1, window_bounds = array<i64: 80, 32>}, {pipeline_mode = #tpu.pipeline_mode<synchronous>, transform_indices = @transform_2, window_bounds = array<i64: 3, 32>}, {transform_indices = @transform_3, window_bounds = array<i64: 8, 32>}]} {
    %c0 = arith.constant 0 : index
    %c0_0 = arith.constant 0 : index
    %0 = vector.load %arg1[%c0, %c0_0] : memref<8x16xf32, #tpu.memory_space<vmem>>, vector<8x16xf32>
    %1 = arith.truncf %0 : vector<8x16xf32> to vector<8x16xbf16>
    %c0_1 = arith.constant 0 : index
    %c0_2 = arith.constant 0 : index
    %2 = vector.load %arg2[%c0_1, %c0_2] : memref<80x32xbf16, #tpu.memory_space<vmem>>, vector<16x32xbf16>
    %c16 = arith.constant 16 : index
    %c0_3 = arith.constant 0 : index
    %3 = vector.load %arg2[%c16, %c0_3] : memref<80x32xbf16, #tpu.memory_space<vmem>>, vector<32x32xbf16>
    %c48 = arith.constant 48 : index
    %c0_4 = arith.constant 0 : index
    %4 = vector.load %arg2[%c48, %c0_4] : memref<80x32xbf16, #tpu.memory_space<vmem>>, vector<32x32xbf16>
    %cst = arith.constant dense<0.000000e+00> : vector<8x32xf32>
    %5 = tpu.matmul %1, %2, %cst {dimension_numbers = #tpu.dot_dimension_numbers<[1], [0], [0], [1], [0, 0, 1, 1], [], []>} : vector<8x16xbf16>, vector<16x32xbf16>, vector<8x32xf32> -> vector<8x32xf32>
    %c0_5 = arith.constant 0 : index
    %c0_6 = arith.constant 0 : index
    %6 = vector.load %arg3[%c0_5, %c0_6] : memref<3x32xf32, #tpu.memory_space<vmem>>, vector<1x32xf32>
    %7 = vector.broadcast %6 : vector<1x32xf32> to vector<8x32xf32>
    %8 = arith.addf %5, %7 : vector<8x32xf32>
    %cst_7 = arith.constant 0.000000e+00 : f32
    %9 = vector.broadcast %cst_7 : f32 to vector<8x32xf32>
    %10 = arith.maximumf %8, %9 : vector<8x32xf32>
    %11 = arith.truncf %10 : vector<8x32xf32> to vector<8x32xbf16>
    %cst_8 = arith.constant dense<0.000000e+00> : vector<8x32xf32>
    %12 = tpu.matmul %11, %3, %cst_8 {dimension_numbers = #tpu.dot_dimension_numbers<[1], [0], [0], [1], [0, 0, 1, 1], [], []>} : vector<8x32xbf16>, vector<32x32xbf16>, vector<8x32xf32> -> vector<8x32xf32>
    %c1 = arith.constant 1 : index
    %c0_9 = arith.constant 0 : index
    %13 = vector.load %arg3[%c1, %c0_9] : memref<3x32xf32, #tpu.memory_space<vmem>>, vector<1x32xf32>
    %14 = vector.broadcast %13 : vector<1x32xf32> to vector<8x32xf32>
    %15 = arith.addf %12, %14 : vector<8x32xf32>
    %cst_10 = arith.constant 0.000000e+00 : f32
    %16 = vector.broadcast %cst_10 : f32 to vector<8x32xf32>
    %17 = arith.maximumf %15, %16 : vector<8x32xf32>
    %18 = arith.truncf %17 : vector<8x32xf32> to vector<8x32xbf16>
    %cst_11 = arith.constant dense<0.000000e+00> : vector<8x32xf32>
    %19 = tpu.matmul %18, %4, %cst_11 {dimension_numbers = #tpu.dot_dimension_numbers<[1], [0], [0], [1], [0, 0, 1, 1], [], []>} : vector<8x32xbf16>, vector<32x32xbf16>, vector<8x32xf32> -> vector<8x32xf32>
    %c2 = arith.constant 2 : index
    %c0_12 = arith.constant 0 : index
    %20 = vector.load %arg3[%c2, %c0_12] : memref<3x32xf32, #tpu.memory_space<vmem>>, vector<1x32xf32>
    %21 = vector.broadcast %20 : vector<1x32xf32> to vector<8x32xf32>
    %22 = arith.addf %19, %21 : vector<8x32xf32>
    %c0_13 = arith.constant 0 : index
    %c0_14 = arith.constant 0 : index
    %23 = vector.load %arg4[%c0_13, %c0_14] : memref<8x32xf32, #tpu.memory_space<vmem>>, vector<8x32xf32>
    tpu.vector_store %arg4[%c0_13, %c0_14], %22 {strides = array<i32>} : memref<8x32xf32, #tpu.memory_space<vmem>>, vector<8x32xf32>,
    return
  }
  func.func @transform_0(%arg0: i32) -> (i32, i32) {
    %c0_i32 = arith.constant 0 : i32
    %c0_i32_0 = arith.constant 0 : i32
    return %arg0, %c0_i32 : i32, i32
  }
  func.func @transform_1(%arg0: i32) -> (i32, i32) {
    %c0_i32 = arith.constant 0 : i32
    %c0_i32_0 = arith.constant 0 : i32
    %c0_i32_1 = arith.constant 0 : i32
    return %c0_i32, %c0_i32_0 : i32, i32
  }
  func.func @transform_2(%arg0: i32) -> (i32, i32) {
    %c0_i32 = arith.constant 0 : i32
    %c0_i32_0 = arith.constant 0 : i32
    %c0_i32_1 = arith.constant 0 : i32
    return %c0_i32, %c0_i32_0 : i32, i32
  }
  func.func @transform_3(%arg0: i32) -> (i32, i32) {
    %c0_i32 = arith.constant 0 : i32
    %c0_i32_0 = arith.constant 0 : i32
    return %arg0, %c0_i32 : i32, i32
  }
}

</mosaic_0001>

<bundles_post_ra>
// kernel: tpu_custom_call.1
= control target key start
LH: loop header
LB: loop body
LE: loop exit
PB: predicated region body
PF: predicated region fallthrough
CT: control target
= control target key end

     0   :  { %v296_v1 = vmov 0.0   ;;  %vm39_vm0 = vcmask 130048   ;;  %vm297_vm1 = vmmov 0   ;;  %s361_s0 = inlined_call_operand.vmem [shape: f32[8,16], index: 0, kind: input, shape index: {}]   ;;  %s362_s1 = inlined_call_operand.vmem [shape: bf16[80,32], index: 1, kind: input, shape index: {}]   ;;  %s363_s2 = inlined_call_operand.vmem [shape: f32[3,32], index: 2, kind: input, shape index: {}]   ;;  %s364_s3 = inlined_call_operand.hbm [shape: f32[8,32], index: 3, kind: output, shape index: {}]  }
   0x1   :  { %v267_v0 = vld [vmem:[%s362_s1] sm:$0xff]   ;;  %242 = vmatprep.subr.bf16.mxu0 %v296_v1  ;;  %248 = vmatprep.subr.bf16.mxu1 %v296_v1 }
   0x2   :  { %v16_v2 = vld [vmem:[%s361_s0] sm:$0xff]  ;;  %243 = vmatpush3.bf16.msra.mxu0 %v267_v0  ;;  %244 = vmatprep.mubr.msk.bf16.mxu0 %vm297_vm1, %v296_v1 }
   0x3   :  { %v17_v3 = vpack.c.bf16 %v16_v2, %v16_v2  ;;  %252 = vmatprep.mubr.msk.bf16.mxu1 %vm297_vm1, %v296_v1  ;;  %256 = vmatprep.subr.bf16.mxu0 %v296_v1 }
   0x4   :  { %8 = vsyncpa [#allocation3], 0  ;;  %v268_v4 = vld [vmem:[%s362_s1 + $0x8] sm:$0xff]   ;;  %v269_v5 = vld [vmem:[%s362_s1 + $0x10] sm:$0xff]   ;;  %vm102_vm2 = vcmask 261120   ;;  %s298_s29 = smov [#allocation2]  }
   0x5   :  { %245 = vmatmul.mubr.msk.bf16.vlgmr.msra.gmra.mrb[0].mxu0 %vm39_vm0, %v17_v3  ;;  %249 = vmatpush3.bf16.msra.mxu1 %v268_v4  ;;  %v270_v6 = vld [vmem:[%s362_s1 + $0x18] sm:$0xff]   ;;  %v223_v7 = vld [vmem:[%s363_s2] ss:$0 sm:$0xff]  ;;  %v226_v16 = vld [vmem:[%s363_s2 + $0x1] ss:$0 sm:$0xff] }
   0x6   :  { %260 = vmatprep.mubr.msk.bf16.mxu0 %vm297_vm1, %v296_v1  ;;  %250 = vmatprep.subr.bf16.mxu1 %v296_v1  ;;  %v271_v15 = vld [vmem:[%s362_s1 + $0x20] sm:$0xff]   ;;  %s215_s1 = sshll.u32 %s298_s29, 4  ;;  %s216_s1 = int_to_ptr.vmem [resolvable:$true] %s215_s1 }
   0x7   :  { %257 = vmatpush3.bf16.msra.mxu0 %v270_v6  ;;  %v230_v24 = vld [vmem:[%s363_s2 + $0x2] ss:$0 sm:$0xff]  ;;  %s272_s30 = scalar_lea.vmem %s216_s1, 128  ;;  %p277_p1 = scmp.lt.s32.totalorder %s216_s1, %s216_s1 }
   0x8   :  { %258 = vmatprep.subr.bf16.mxu0 %v296_v1  ;;  %p273_p0 = scmp.ne.s32.totalorder %s216_s1, %s272_s30  ;;  %p278_p2 = scmp.lt.s32.totalorder %s272_s30, %s272_s30 }
   0x9   :  { %251 = vmatpush3.bf16.msra.mxu1 %v269_v5 }
   0xa   :  { %p279_p3 = por %p278_p2, %p277_p1 }
   0xb   :  { %259 = vmatpush3.bf16.msra.mxu0 %v271_v15 }
   0xc   :  { %p280_p4 = pnand %p279_p3, %p273_p0 }
  0xd8   :  { %v77_v8 = vpop.f32.mrb[0].mxu0 }
  0xd9   :  { %v78_v9 = vadd.f32 %v223_v7, %v77_v8  ;;  %v246_v10 = vpop.f32.mrb[1].mxu0 }
  0xda   :  { %v80_v11 = vpop.f32.mrb[2].mxu0 }
  0xdb   :  { %v83_v12 = vmax.f32 %v78_v9, 0.0  ;;  %v247_v13 = vpop.f32.mrb[3].mxu0 }
  0xdd   :  { %v84_v14 = vpack.c.bf16 %v83_v12, %v83_v12 }
  0xdf   :  { %253 = vmatmul.mubr.msk.bf16.vlgmr.msra.gmra.mrb[0].mxu1 %vm102_vm2, %v84_v14 }
 0x1b2   :  { %v140_v17 = vpop.f32.mrb[0].mxu1 }
 0x1b3   :  { %v141_v18 = vadd.f32 %v226_v16, %v140_v17  ;;  %v254_v19 = vpop.f32.mrb[1].mxu1 }
 0x1b4   :  { %v143_v20 = vpop.f32.mrb[2].mxu1 }
 0x1b5   :  { %v146_v21 = vmax.f32 %v141_v18, 0.0  ;;  %v255_v22 = vpop.f32.mrb[3].mxu1 }
 0x1b7   :  { %v147_v23 = vpack.c.bf16 %v146_v21, %v146_v21 }
 0x1b9   :  { %261 = vmatmul.mubr.msk.bf16.vlgmr.msra.gmra.mrb[4].mxu0 %vm102_vm2, %v147_v23 }
 0x28c   :  { %v202_v25 = vpop.f32.mrb[4].mxu0 }
 0x28d   :  { %v203_v26 = vadd.f32 %v230_v24, %v202_v25  ;;  %v262_v27 = vpop.f32.mrb[5].mxu0 }
 0x28e   :  { %v205_v28 = vpop.f32.mrb[6].mxu0 }
 0x28f   :  { %208 = vst.msk [vmem:[#allocation2] sm:$0xff] %vm102_vm2, %v203_v26  ;;  %v263_v29 = vpop.f32.mrb[7].mxu0 }
 0x290   :  { %283 = shalt.err (!%p280_p4)
}
 0x291   :  { %s284_s2 = scalar_lea.hbm %s364_s3, 128 }
 0x292   :  { %p285_p5 = scmp.ne.s32.totalorder %s364_s3, %s284_s2  ;;  %p288_p6 = scmp.lt.u32.totalorder %s284_s2, %s364_s3 }
 0x294   :  { %p290_p7 = pnand %p288_p6, %p285_p5 }
 0x296   :  { %293 = shalt.err (!%p290_p7)
}
 0x297   :  { %218 = dma.vmem_to_hbm [thread:$0]  %s216_s1, 128, %s364_s3, [#allocation3]  }
 0x298   :  { %294 = dma.done.wait [#allocation3], 128  }
 0x299   :  { %295 = vsyncadd [#allocation3], 4294967168 }
 0x29a   :  { %222 = vsyncpa [#allocation3], 1 }

</bundles_post_ra>
